<compile_context>
chip_gen: v7x
topology: tpu7x:2x2x1
jax: 0.10.0
libtpu: 0.0.40
codegen_flags: <defaults>
</compile_context>

<pallas_src>
import functools

import jax
import jax.numpy as jnp
from jax.experimental import pallas as pl
from jax.experimental.pallas import tpu as pltpu

# ----------------------- config (small, self-consistent) -----------------------
VOCAB      = 100
MAX_LEN    = 16      # L
WORD_DIM   = 32      # D
POS_DIM    = 8       # unused in forward (pos embeddings never applied)
POS_DIS    = 10
FILTER_NUM = 32      # F
WINDOW     = 3       # conv kernel height; padding=(1,0) => output length == MAX_LEN
HIDDEN     = 32      # H
CLASS_NUM  = 8       # C
BATCH      = 8       # B  (8 * MAX_LEN = 128 rows -> one full MXU M pass per step)

B_BLOCK    = 8       # examples per grid step (B_BLOCK * MAX_LEN = 128 matmul rows)
OUT_PAD    = 128     # lane-padded logits width (sliced to CLASS_NUM in wrapper)
NEG_BIG    = -3.0e38 # finite additive mask value (autodiff-safe, tanh -> -1)


# ------------------------------- Pallas kernel ---------------------------------
def cnn_kernel(x_ref, maskb_ref, convw_ref, linw_ref, densew_ref, bias_ref,
               out_ref, *, max_len):
    # x: (B_BLOCK*L, WINDOW*D) im2col rows -- one MXU matmul replaces the conv.
    conv = jnp.dot(x_ref[...], convw_ref[...],
                   preferred_element_type=jnp.float32)           # (BB*L, F)
    filter_num = conv.shape[1]
    hidden = linw_ref.shape[1]
    bias = bias_ref[...]                                          # (3, OUT_PAD), loaded once

    # Additive mask (0 valid / -3e38 padded) broadcasts along the lane (F) axis.
    conv = conv + maskb_ref[...]                                  # (BB*L, F)

    # Masked max-pool over the sequence axis (free reshape: L is a multiple of 8,
    # split happens along the sublane axis only).
    bb = conv.shape[0] // max_len
    pool = jnp.max(conv.reshape(bb, max_len, filter_num), axis=1)  # (BB, F)

    # Conv bias hoisted past the max: max(x + b) == max(x) + b.
    feat = jnp.tanh(pool + bias[0:1, :filter_num])                 # (BB, F)
    hid = jnp.tanh(
        jnp.dot(feat, linw_ref[...], preferred_element_type=jnp.float32)
        + bias[1:2, :hidden])                                      # (BB, H)
    # TODO(synk): nn.Dropout is identity at inference; training-mode dropout not emulated.
    logits = (jnp.dot(hid, densew_ref[...], preferred_element_type=jnp.float32)
              + bias[2:3, :])                                      # (BB, OUT_PAD)
    out_ref[...] = logits                                          # lane-dense full-width store


# ------------------------------ wrapper / glue ----------------------------------
def prepare_kernel_params(params):
    """One-time packing of weights into kernel-friendly layouts (6 kernel inputs)."""
    conv_w_flat = params["conv_w"].reshape(WINDOW * WORD_DIM, FILTER_NUM)
    dense_w_pad = jnp.zeros((HIDDEN, OUT_PAD), jnp.float32)
    dense_w_pad = dense_w_pad.at[:, :CLASS_NUM].set(params["dense_w"])
    bias_pack = jnp.zeros((3, OUT_PAD), jnp.float32)
    bias_pack = bias_pack.at[0, :FILTER_NUM].set(params["conv_b"])
    bias_pack = bias_pack.at[1, :HIDDEN].set(params["lin_b"])
    bias_pack = bias_pack.at[2, :CLASS_NUM].set(params["dense_b"])
    return {
        "word_emb": params["word_emb"],
        "conv_w_flat": conv_w_flat,       # (WINDOW*D, F)
        "lin_w": params["lin_w"],         # (F, H)
        "dense_w_pad": dense_w_pad,       # (H, OUT_PAD)
        "bias_pack": bias_pack,           # (3, OUT_PAD)
    }


def cnn_forward(data, kparams):
    """data: (B, 4, MAX_LEN) int32; returns logits (B, CLASS_NUM) f32."""
    B = data.shape[0]
    token = data[:, 0, :]                                        # (B, L)
    mask = data[:, 3, :]                                         # (B, L)

    # ---- plain-JAX glue: embedding gather + im2col + additive mask ----
    emb = jnp.take(kparams["word_emb"], token, axis=0)           # (B, L, D)
    emb_pad = jnp.pad(emb, ((0, 0), (1, 1), (0, 0)))             # (B, L+2, D)
    cols = jnp.concatenate(
        [emb_pad[:, w:w + MAX_LEN, :] for w in range(WINDOW)], axis=-1)
    x = cols.reshape(B * MAX_LEN, WINDOW * WORD_DIM)             # (B*L, 96)
    mask_bias = jnp.where(mask != 0, 0.0, NEG_BIG).astype(jnp.float32)
    mask_bias = mask_bias.reshape(B * MAX_LEN, 1)                # (B*L, 1)

    # Pad batch to a multiple of B_BLOCK (padded rows fully masked, sliced away).
    Bp = ((B + B_BLOCK - 1) // B_BLOCK) * B_BLOCK
    if Bp != B:
        pad_rows = (Bp - B) * MAX_LEN
        x = jnp.pad(x, ((0, pad_rows), (0, 0)))
        mask_bias = jnp.pad(mask_bias, ((0, pad_rows), (0, 0)),
                            constant_values=NEG_BIG)

    rows = B_BLOCK * MAX_LEN
    out = pl.pallas_call(
        functools.partial(cnn_kernel, max_len=MAX_LEN),
        out_shape=jax.ShapeDtypeStruct((Bp, OUT_PAD), jnp.float32),
        grid=(Bp // B_BLOCK,),
        in_specs=[
            pl.BlockSpec((rows, WINDOW * WORD_DIM),       lambda b: (b, 0)),
            pl.BlockSpec((rows, 1),                       lambda b: (b, 0)),
            pl.BlockSpec((WINDOW * WORD_DIM, FILTER_NUM), lambda b: (0, 0)),
            pl.BlockSpec((FILTER_NUM, HIDDEN),            lambda b: (0, 0)),
            pl.BlockSpec((HIDDEN, OUT_PAD),               lambda b: (0, 0)),
            pl.BlockSpec((3, OUT_PAD),                    lambda b: (0, 0)),
        ],
        out_specs=pl.BlockSpec((B_BLOCK, OUT_PAD), lambda b: (b, 0)),
        compiler_params=pltpu.CompilerParams(
            dimension_semantics=("parallel",)),
    )(x, mask_bias, kparams["conv_w_flat"], kparams["lin_w"],
      kparams["dense_w_pad"], kparams["bias_pack"])
    return out[:B, :CLASS_NUM]


# ----------------------------- deterministic init ------------------------------
def _xavier_normal(key, shape, fan_in, fan_out):
    std = (2.0 / (fan_in + fan_out)) ** 0.5
    return std * jax.random.normal(key, shape, dtype=jnp.float32)


def init_params(key):
    k = jax.random.split(key, 4)
    word_emb = jax.random.normal(k[0], (VOCAB, WORD_DIM), dtype=jnp.float32)
    # torch conv.weight: (F, 1, WINDOW, D)  ->  kernel layout (WINDOW, D, F)
    conv_w_t = _xavier_normal(k[1], (FILTER_NUM, 1, WINDOW, WORD_DIM),
                              fan_in=WINDOW * WORD_DIM,
                              fan_out=FILTER_NUM * WINDOW * WORD_DIM)
    conv_w = jnp.transpose(conv_w_t[:, 0], (1, 2, 0))            # (WINDOW, D, F)
    # torch linear.weight: (H, F) -> (F, H); dense.weight: (C, H) -> (H, C)
    lin_w = _xavier_normal(k[2], (HIDDEN, FILTER_NUM), FILTER_NUM, HIDDEN).T
    dense_w = _xavier_normal(k[3], (CLASS_NUM, HIDDEN), HIDDEN, CLASS_NUM).T
    return {
        "word_emb": word_emb,
        "conv_w": conv_w,
        "conv_b": jnp.zeros((FILTER_NUM,), jnp.float32),
        "lin_w": lin_w,
        "lin_b": jnp.zeros((HIDDEN,), jnp.float32),
        "dense_w": dense_w,
        "dense_b": jnp.zeros((CLASS_NUM,), jnp.float32),
    }


# ------------------------------ plain-JAX reference ----------------------------
def cnn_reference(data, params):
    token = data[:, 0, :]
    mask = data[:, 3, :]
    emb = jnp.take(params["word_emb"], token, axis=0)
    emb_pad = jnp.pad(emb, ((0, 0), (1, 1), (0, 0)))
    conv = jnp.zeros((data.shape[0], MAX_LEN, FILTER_NUM), jnp.float32)
    for w in range(WINDOW):
        conv = conv + jnp.einsum("btd,df->btf",
                                 emb_pad[:, w:w + MAX_LEN, :], params["conv_w"][w])
    conv = conv + params["conv_b"]
    conv = jnp.where(mask[:, :, None] != 0, conv, -jnp.inf)
    pool = jnp.max(conv, axis=1)
    feat = jnp.tanh(pool)
    hid = jnp.tanh(feat @ params["lin_w"] + params["lin_b"])
    return hid @ params["dense_w"] + params["dense_b"]


# ------------------------------------ main --------------------------------------
if __name__ == "__main__":
    key = jax.random.PRNGKey(0)
    k_param, k_tok, k_pos = jax.random.split(key, 3)

    params = init_params(k_param)
    kparams = prepare_kernel_params(params)

    # data[:, 0] = token ids, data[:, 1:3] = (unused) pos ids, data[:, 3] = mask
    token = jax.random.randint(k_tok, (BATCH, MAX_LEN), 0, VOCAB, dtype=jnp.int32)
    pos = jax.random.randint(k_pos, (BATCH, 2, MAX_LEN), 0, 2 * POS_DIS + 3,
                             dtype=jnp.int32)
    lengths = jnp.array([16, 12, 9, 5, 1, 16, 7, 3], dtype=jnp.int32)
    mask = (jnp.arange(MAX_LEN)[None, :] < lengths[:, None]).astype(jnp.int32)
    data = jnp.concatenate([token[:, None, :], pos, mask[:, None, :]], axis=1)

    logits = jax.block_until_ready(cnn_forward(data, kparams))
    ref = cnn_reference(data, params)

    assert logits.shape == (BATCH, CLASS_NUM)
    assert jnp.allclose(logits, ref, atol=1e-4, rtol=1e-4)
    print("KERNEL_OK")
</pallas_src>

<mosaic_0001>
module attributes {stable_mosaic.version = 11 : i64} {
  func.func @cnn_kernel(%arg0: i32, %arg1: memref<128x96xf32, #tpu.memory_space<vmem>>, %arg2: memref<128x1xf32, #tpu.memory_space<vmem>>, %arg3: memref<96x32xf32, #tpu.memory_space<vmem>>, %arg4: memref<32x32xf32, #tpu.memory_space<vmem>>, %arg5: memref<32x128xf32, #tpu.memory_space<vmem>>, %arg6: memref<3x128xf32, #tpu.memory_space<vmem>>, %arg7: memref<8x128xf32, #tpu.memory_space<vmem>>) attributes {dimension_semantics = [#tpu.dimension_semantics<parallel>], iteration_bounds = array<i64: 1>, scalar_prefetch = 0 : i64, scratch_operands = 0 : i64, tpu.core_type = #tpu.core_type<tc>, window_params = [{transform_indices = @transform_0, window_bounds = array<i64: 128, 96>}, {transform_indices = @transform_1, window_bounds = array<i64: 128, 1>}, {pipeline_mode = #tpu.pipeline_mode<synchronous>, transform_indices = @transform_2, window_bounds = array<i64: 96, 32>}, {pipeline_mode = #tpu.pipeline_mode<synchronous>, transform_indices = @transform_3, window_bounds = array<i64: 32, 32>}, {pipeline_mode = #tpu.pipeline_mode<synchronous>, transform_indices = @transform_4, window_bounds = array<i64: 32, 128>}, {pipeline_mode = #tpu.pipeline_mode<synchronous>, transform_indices = @transform_5, window_bounds = array<i64: 3, 128>}, {transform_indices = @transform_6, window_bounds = array<i64: 8, 128>}]} {
    %c0 = arith.constant 0 : index
    %c0_0 = arith.constant 0 : index
    %0 = vector.load %arg1[%c0, %c0_0] : memref<128x96xf32, #tpu.memory_space<vmem>>, vector<128x96xf32>
    %c0_1 = arith.constant 0 : index
    %c0_2 = arith.constant 0 : index
    %1 = vector.load %arg3[%c0_1, %c0_2] : memref<96x32xf32, #tpu.memory_space<vmem>>, vector<96x32xf32>
    %cst = arith.constant dense<0.000000e+00> : vector<128x32xf32>
    %2 = tpu.matmul %0, %1, %cst {dimension_numbers = #tpu.dot_dimension_numbers<[1], [0], [0], [1], [0, 0, 1, 1], [], []>} : vector<128x96xf32>, vector<96x32xf32>, vector<128x32xf32> -> vector<128x32xf32>
    %c0_3 = arith.constant 0 : index
    %c0_4 = arith.constant 0 : index
    %3 = vector.load %arg6[%c0_3, %c0_4] : memref<3x128xf32, #tpu.memory_space<vmem>>, vector<3x128xf32>
    %c0_5 = arith.constant 0 : index
    %c0_6 = arith.constant 0 : index
    %4 = vector.load %arg2[%c0_5, %c0_6] : memref<128x1xf32, #tpu.memory_space<vmem>>, vector<128x1xf32>
    %5 = vector.broadcast %4 : vector<128x1xf32> to vector<128x32xf32>
    %6 = arith.addf %2, %5 : vector<128x32xf32>
    %7 = vector.shape_cast %6 : vector<128x32xf32> to vector<8x16x32xf32>
    %cst_7 = arith.constant dense<0xFF800000> : vector<8x32xf32>
    %8 = vector.multi_reduction <maximumf>, %7, %cst_7 [1] : vector<8x16x32xf32> to vector<8x32xf32>
    %9 = vector.extract_strided_slice %3 {offsets = [0, 0], sizes = [1, 32], strides = [1, 1]} : vector<3x128xf32> to vector<1x32xf32>
    %10 = vector.broadcast %9 : vector<1x32xf32> to vector<8x32xf32>
    %11 = arith.addf %8, %10 : vector<8x32xf32>
    %12 = math.tanh %11 : vector<8x32xf32>
    %c0_8 = arith.constant 0 : index
    %c0_9 = arith.constant 0 : index
    %13 = vector.load %arg4[%c0_8, %c0_9] : memref<32x32xf32, #tpu.memory_space<vmem>>, vector<32x32xf32>
    %cst_10 = arith.constant dense<0.000000e+00> : vector<8x32xf32>
    %14 = tpu.matmul %12, %13, %cst_10 {dimension_numbers = #tpu.dot_dimension_numbers<[1], [0], [0], [1], [0, 0, 1, 1], [], []>} : vector<8x32xf32>, vector<32x32xf32>, vector<8x32xf32> -> vector<8x32xf32>
    %15 = vector.extract_strided_slice %3 {offsets = [1, 0], sizes = [1, 32], strides = [1, 1]} : vector<3x128xf32> to vector<1x32xf32>
    %16 = vector.broadcast %15 : vector<1x32xf32> to vector<8x32xf32>
    %17 = arith.addf %14, %16 : vector<8x32xf32>
    %18 = math.tanh %17 : vector<8x32xf32>
    %c0_11 = arith.constant 0 : index
    %c0_12 = arith.constant 0 : index
    %19 = vector.load %arg5[%c0_11, %c0_12] : memref<32x128xf32, #tpu.memory_space<vmem>>, vector<32x128xf32>
    %cst_13 = arith.constant dense<0.000000e+00> : vector<8x128xf32>
    %20 = tpu.matmul %18, %19, %cst_13 {dimension_numbers = #tpu.dot_dimension_numbers<[1], [0], [0], [1], [0, 0, 1, 1], [], []>} : vector<8x32xf32>, vector<32x128xf32>, vector<8x128xf32> -> vector<8x128xf32>
    %21 = vector.extract_strided_slice %3 {offsets = [2, 0], sizes = [1, 128], strides = [1, 1]} : vector<3x128xf32> to vector<1x128xf32>
    %22 = vector.broadcast %21 : vector<1x128xf32> to vector<8x128xf32>
    %23 = arith.addf %20, %22 : vector<8x128xf32>
    %c0_14 = arith.constant 0 : index
    %c0_15 = arith.constant 0 : index
    %24 = vector.load %arg7[%c0_14, %c0_15] : memref<8x128xf32, #tpu.memory_space<vmem>>, vector<8x128xf32>
    tpu.vector_store %arg7[%c0_14, %c0_15], %23 {strides = array<i32>} : memref<8x128xf32, #tpu.memory_space<vmem>>, vector<8x128xf32>,
    return
  }
  func.func @transform_0(%arg0: i32) -> (i32, i32) {
    %c0_i32 = arith.constant 0 : i32
    %c0_i32_0 = arith.constant 0 : i32
    return %arg0, %c0_i32 : i32, i32
  }
  func.func @transform_1(%arg0: i32) -> (i32, i32) {
    %c0_i32 = arith.constant 0 : i32
    %c0_i32_0 = arith.constant 0 : i32
    return %arg0, %c0_i32 : i32, i32
  }
  func.func @transform_2(%arg0: i32) -> (i32, i32) {
    %c0_i32 = arith.constant 0 : i32
    %c0_i32_0 = arith.constant 0 : i32
    %c0_i32_1 = arith.constant 0 : i32
    return %c0_i32, %c0_i32_0 : i32, i32
  }
  func.func @transform_3(%arg0: i32) -> (i32, i32) {
    %c0_i32 = arith.constant 0 : i32
    %c0_i32_0 = arith.constant 0 : i32
    %c0_i32_1 = arith.constant 0 : i32
    return %c0_i32, %c0_i32_0 : i32, i32
  }
  func.func @transform_4(%arg0: i32) -> (i32, i32) {
    %c0_i32 = arith.constant 0 : i32
    %c0_i32_0 = arith.constant 0 : i32
    %c0_i32_1 = arith.constant 0 : i32
    return %c0_i32, %c0_i32_0 : i32, i32
  }
  func.func @transform_5(%arg0: i32) -> (i32, i32) {
    %c0_i32 = arith.constant 0 : i32
    %c0_i32_0 = arith.constant 0 : i32
    %c0_i32_1 = arith.constant 0 : i32
    return %c0_i32, %c0_i32_0 : i32, i32
  }
  func.func @transform_6(%arg0: i32) -> (i32, i32) {
    %c0_i32 = arith.constant 0 : i32
    %c0_i32_0 = arith.constant 0 : i32
    return %arg0, %c0_i32 : i32, i32
  }
}

</mosaic_0001>

<bundles_post_ra>
// kernel: tpu_custom_call.1
= control target key start
LH: loop header
LB: loop body
LE: loop exit
PB: predicated region body
PF: predicated region fallthrough
CT: control target
= control target key end

     0   :  { %v865_v5 = vmov 0   ;;  %vm149_vm0 = vcmask 785408   ;;  %s1150_s0 = inlined_call_operand.vmem [shape: f32[128,96], index: 0, kind: input, shape index: {}]   ;;  %s1151_s1 = inlined_call_operand.vmem [shape: f32[128,1], index: 1, kind: input, shape index: {}]   ;;  %s1152_s2 = inlined_call_operand.vmem [shape: f32[96,32], index: 2, kind: input, shape index: {}]   ;;  %s1153_s3 = inlined_call_operand.vmem [shape: f32[32,32], index: 3, kind: input, shape index: {}]   ;;  %s1154_s4 = inlined_call_operand.vmem [shape: f32[32,128], index: 4, kind: input, shape index: {}]   ;;  %s1155_s5 = inlined_call_operand.vmem [shape: f32[3,128], index: 5, kind: input, shape index: {}]   ;;  %s1156_s6 = inlined_call_operand.hbm [shape: f32[8,128], index: 6, kind: output, shape index: {}]  }
   0x1   :  { %v40_v0 = vld [vmem:[%s1152_s2] sm:$0xff]  ;;  %v41_v1 = vld [vmem:[%s1152_s2 + $0x8] sm:$0xff]  ;;  %v42_v2 = vld [vmem:[%s1152_s2 + $0x10] sm:$0xff]  ;;  %822 = vset.pattern.permute.xlu1 %v865_v5  ;;  %821 = vset.pattern.permute.xlu0 %v865_v5 }
   0x2   :  { %v768_v3 = vpack.c.bf16 %v41_v1, %v40_v0  ;;  %v43_v4 = vld [vmem:[%s1152_s2 + $0x18] sm:$0xff]  ;;  %v44_v7 = vld [vmem:[%s1152_s2 + $0x20] sm:$0xff]  ;;  %v45_v8 = vld [vmem:[%s1152_s2 + $0x28] sm:$0xff] }
   0x3   :  { %v772_v6 = vpack.c.bf16 %v43_v4, %v42_v2  ;;  %v24_v9 = vld [vmem:[%s1150_s0] sm:$0xff]  ;;  %v776_v11 = vpack.c.bf16 %v45_v8, %v44_v7  ;;  %v46_v12 = vld [vmem:[%s1152_s2 + $0x30] sm:$0xff]  ;;  %v47_v13 = vld [vmem:[%s1152_s2 + $0x38] sm:$0xff] }
   0x4   :  { %769 = vmatprep.subr.bf16.mxu0 %v768_v3  ;;  %804 = vmatprep.subr.bf16.mxu1 %v768_v3  ;;  %v36_v10 = vld [vmem:[%s1150_s0 + $0x60] sm:$0xff]  ;;  %v780_v14 = vpack.c.bf16 %v47_v13, %v46_v12  ;;  %v55_v16 = vld [vmem:[%s1151_s1 + $0x10] sm:$0xff]  ;;  %v49_v18 = vld [vmem:[%s1152_s2 + $0x48] sm:$0xff] }
   0x5   :  { %771 = vmatpush3.bf16.msra.mxu0 %v768_v3  ;;  %810 = vmatpush3.bf16.msra.mxu1 %v768_v3  ;;  %v57_v15 = vld [vmem:[%s1151_s1 + $0x20] sm:$0xff]  ;;  %v58_v19 = vld [vmem:[%s1151_s1 + $0x28] sm:$0xff]  ;;  %v56_v20 = vld [vmem:[%s1151_s1 + $0x18] sm:$0xff] }
   0x6   :  { %773 = vmatprep.subr.bf16.mxu0 %v772_v6  ;;  %805 = vmatprep.subr.bf16.mxu1 %v772_v6  ;;  %v48_v17 = vld [vmem:[%s1152_s2 + $0x40] sm:$0xff]  ;;  %v50_v22 = vld [vmem:[%s1152_s2 + $0x50] sm:$0xff]  ;;  %v51_v23 = vld [vmem:[%s1152_s2 + $0x58] sm:$0xff] }
   0x7   :  { %722 = vmatprep.mubr.msk.f32.mxu0 %vm149_vm0, %v24_v9  ;;  %740 = vmatprep.mubr.msk.f32.mxu1 %vm149_vm0, %v36_v10  ;;  %v784_v21 = vpack.c.bf16 %v49_v18, %v48_v17 }
   0x8   :  { %91 = vperm.xlu1 %822, %v57_v15   ;;  %81 = vperm.xlu0 %821, %v55_v16  }
   0x9   :  { %775 = vmatpush3.bf16.msra.mxu0 %v772_v6  ;;  %811 = vmatpush3.bf16.msra.mxu1 %v772_v6 }
   0xa   :  { %777 = vmatprep.subr.bf16.mxu0 %v776_v11  ;;  %806 = vmatprep.subr.bf16.mxu1 %v776_v11 }
   0xc   :  { %96 = vperm.xlu1 %822, %v58_v19   ;;  %86 = vperm.xlu0 %821, %v56_v20  }
   0xd   :  { %779 = vmatpush3.bf16.msra.mxu0 %v776_v11  ;;  %812 = vmatpush3.bf16.msra.mxu1 %v776_v11 }
   0xe   :  { %781 = vmatprep.subr.bf16.mxu0 %v780_v14  ;;  %807 = vmatprep.subr.bf16.mxu1 %v780_v14 }
   0xf   :  { %11 = vsyncpa [#allocation3], 0  ;;  %v54_v24 = vld [vmem:[%s1151_s1 + $0x8] sm:$0xff]  ;;  %v53_v25 = vld [vmem:[%s1151_s1] sm:$0xff]  ;;  %v788_v26 = vpack.c.bf16 %v51_v23, %v50_v22  ;;  %v866_v54 = vmov 0.0|0.0   ;;  %vm867_vm1 = vmmov 0  }
  0x10   :  { %76 = vperm.xlu1 %822, %v54_v24   ;;  %71 = vperm.xlu0 %821, %v53_v25   ;;  %v60_v27 = vld [vmem:[%s1151_s1 + $0x38] sm:$0xff]  ;;  %v59_v28 = vld [vmem:[%s1151_s1 + $0x30] sm:$0xff]  ;;  %v62_v29 = vld [vmem:[%s1151_s1 + $0x48] sm:$0xff]  ;;  %v868_v58 = vmov 0.0   ;;  %vm343_vm2 = vcmask 261120   ;;  %vm453_vm3 = vcmask 1041409  }
  0x11   :  { %783 = vmatpush3.bf16.msra.mxu0 %v780_v14  ;;  %813 = vmatpush3.bf16.msra.mxu1 %v780_v14  ;;  %v61_v30 = vld [vmem:[%s1151_s1 + $0x40] sm:$0xff]  ;;  %v25_v31 = vld [vmem:[%s1150_s0 + $0x8] sm:$0xff]  ;;  %v26_v33 = vld [vmem:[%s1150_s0 + $0x10] sm:$0xff]  ;;  %vm456_vm4 = vcmask 1042434   ;;  %vm459_vm5 = vcmask 1043459   ;;  %vm462_vm6 = vcmask 1044484  }
  0x12   :  { %785 = vmatprep.subr.bf16.mxu0 %v784_v21  ;;  %808 = vmatprep.subr.bf16.mxu1 %v784_v21  ;;  %v37_v32 = vld [vmem:[%s1150_s0 + $0x68] sm:$0xff]  ;;  %v38_v34 = vld [vmem:[%s1150_s0 + $0x70] sm:$0xff]  ;;  %v64_v35 = vld [vmem:[%s1151_s1 + $0x58] sm:$0xff]  ;;  %vm465_vm7 = vcmask 1045509   ;;  %vm468_vm8 = vcmask 1046534   ;;  %vm471_vm9 = vcmask 1047559  }
  0x13   :  { %v63_v36 = vld [vmem:[%s1151_s1 + $0x50] sm:$0xff]  ;;  %v27_v37 = vld [vmem:[%s1150_s0 + $0x18] sm:$0xff]  ;;  %v28_v39 = vld [vmem:[%s1150_s0 + $0x20] sm:$0xff] }
  0x14   :  { %106 = vperm.xlu1 %822, %v60_v27   ;;  %101 = vperm.xlu0 %821, %v59_v28   ;;  %v39_v38 = vld [vmem:[%s1150_s0 + $0x78] sm:$0xff]  ;;  %v66_v40 = vld [vmem:[%s1151_s1 + $0x68] sm:$0xff]  ;;  %v65_v41 = vld [vmem:[%s1151_s1 + $0x60] sm:$0xff] }
  0x15   :  { %787 = vmatpush3.bf16.msra.mxu0 %v784_v21  ;;  %814 = vmatpush3.bf16.msra.mxu1 %v784_v21  ;;  %v29_v42 = vld [vmem:[%s1150_s0 + $0x28] sm:$0xff]  ;;  %v30_v43 = vld [vmem:[%s1150_s0 + $0x30] sm:$0xff]  ;;  %v68_v44 = vld [vmem:[%s1151_s1 + $0x78] sm:$0xff] }
  0x16   :  { %789 = vmatprep.subr.bf16.mxu0 %v788_v26  ;;  %809 = vmatprep.subr.bf16.mxu1 %v788_v26  ;;  %v67_v45 = vld [vmem:[%s1151_s1 + $0x70] sm:$0xff]  ;;  %v31_v46 = vld [vmem:[%s1150_s0 + $0x38] sm:$0xff]  ;;  %v32_v47 = vld [vmem:[%s1150_s0 + $0x40] sm:$0xff] }
  0x17   :  { %v33_v48 = vld [vmem:[%s1150_s0 + $0x48] sm:$0xff]  ;;  %v34_v49 = vld [vmem:[%s1150_s0 + $0x50] sm:$0xff]  ;;  %v35_v50 = vld [vmem:[%s1150_s0 + $0x58] sm:$0xff] }
  0x18   :  { %116 = vperm.xlu1 %822, %v62_v29   ;;  %111 = vperm.xlu0 %821, %v61_v30   ;;  %v436_v51 = vld [vmem:[%s1153_s3] sm:$0xff]  ;;  %v437_v52 = vld [vmem:[%s1153_s3 + $0x8] sm:$0xff]  ;;  %v438_v55 = vld [vmem:[%s1153_s3 + $0x10] sm:$0xff] }
  0x19   :  { %791 = vmatpush3.bf16.msra.mxu0 %v788_v26  ;;  %815 = vmatpush3.bf16.msra.mxu1 %v788_v26  ;;  %v793_v53 = vpack.c.bf16 %v437_v52, %v436_v51  ;;  %v439_v56 = vld [vmem:[%s1153_s3 + $0x18] sm:$0xff] }
  0x1a   :  { %792 = vmatprep.subr.bf16.mxu1 %v866_v54  ;;  %v796_v57 = vpack.c.bf16 %v439_v56, %v438_v55 }
  0x1c   :  { %723 = vmatmul.mubr.msk.f32.vlgmr.msra.gmra.mrb[0].mxu0 %vm149_vm0, %v25_v31  ;;  %741 = vmatmul.mubr.msk.f32.vlgmr.msra.gmra.mrb[0].mxu1 %vm149_vm0, %v37_v32 }
  0x1d   :  { %725 = vmatprep.mubr.msk.f32.mxu0 %vm149_vm0, %v26_v33  ;;  %743 = vmatprep.mubr.msk.f32.mxu1 %vm149_vm0, %v38_v34  ;;  %v416_v34 = vlaneseq }
  0x1e   :  { %126 = vperm.xlu1 %822, %v64_v35   ;;  %121 = vperm.xlu0 %821, %v63_v36  }
  0x1f   :  { %794 = vmatpush3.bf16.msra.mxu1 %v793_v53 }
  0x20   :  { %726 = vmatmul.mubr.msk.f32.gmra.mrb[2].mxu0 %vm149_vm0, %v27_v37  ;;  %744 = vmatmul.mubr.msk.f32.gmra.mrb[2].mxu1 %vm149_vm0, %v39_v38 }
  0x21   :  { %728 = vmatprep.mubr.msk.f32.mxu0 %vm149_vm0, %v28_v39  ;;  %795 = vmatprep.subr.bf16.mxu1 %v866_v54 }
  0x22   :  { %136 = vperm.xlu1 %822, %v66_v40   ;;  %131 = vperm.xlu0 %821, %v65_v41  }
  0x23   :  { %754 = vmatprep.mubr.msk.f32.mxu1 %vm867_vm1, %v868_v58  ;;  %797 = vmatpush3.bf16.msra.mxu1 %v796_v57 }
  0x24   :  { %729 = vmatmul.mubr.msk.f32.gmra.mrb[4].mxu0 %vm149_vm0, %v29_v42  ;;  %798 = vmatprep.subr.bf16.mxu1 %v866_v54 }
  0x25   :  { %731 = vmatprep.mubr.msk.f32.mxu0 %vm149_vm0, %v30_v43 }
  0x26   :  { %146 = vperm.xlu1 %822, %v68_v44   ;;  %141 = vperm.xlu0 %821, %v67_v45  }
  0x28   :  { %732 = vmatmul.mubr.msk.f32.gmra.mrb[6].mxu0 %vm149_vm0, %v31_v46 }
  0x29   :  { %734 = vmatprep.mubr.msk.f32.mxu0 %vm149_vm0, %v32_v47  ;;  %v1086_v47 = vshrl.u32 %v416_v34, 7 }
  0x2c   :  { %735 = vmatmul.mubr.msk.f32.gmra.mrb[8].mxu0 %vm149_vm0, %v33_v48 }
  0x2d   :  { %737 = vmatprep.mubr.msk.f32.mxu0 %vm149_vm0, %v34_v49 }
  0x30   :  { %738 = vmatmul.mubr.msk.f32.gmra.mrb[10].mxu0 %vm149_vm0, %v35_v50 }
  0x87   :  { %v92_v59 = vpop.permute.xlu1 %91  ;;  %v82_v60 = vpop.permute.xlu0 %81 }
  0x8b   :  { %v97_v61 = vpop.permute.xlu1 %96  ;;  %v87_v62 = vpop.permute.xlu0 %86 }
  0x8f   :  { %v77_v63 = vpop.permute.xlu1 %76  ;;  %v72_v0 = vpop.permute.xlu0 %71 }
  0x93   :  { %v107_v1 = vpop.permute.xlu1 %106  ;;  %v102_v2 = vpop.permute.xlu0 %101 }
  0x97   :  { %v1070_v3 = vpop.permute.xlu1 %116  ;;  %v1072_v4 = vpop.permute.xlu0 %111 }
  0x9d   :  { %v1074_v5 = vpop.permute.xlu1 %126  ;;  %v1076_v6 = vpop.permute.xlu0 %121 }
  0xa1   :  { %v137_v7 = vpop.permute.xlu1 %136  ;;  %v132_v8 = vpop.permute.xlu0 %131 }
  0xa5   :  { %v147_v17 = vpop.permute.xlu1 %146  ;;  %v142_v18 = vpop.permute.xlu0 %141 }
  0xef   :  { %v724_v9 = vpop.f32.mrb[0].mxu0  ;;  %v742_v10 = vpop.f32.mrb[0].mxu1 }
  0xf0   :  { %v270_v11 = vadd.f32 %v724_v9, %v77_v63  ;;  %v330_v12 = vadd.f32 %v742_v10, %v137_v7  ;;  %v264_v13 = vpop.f32.mrb[1].mxu0  ;;  %v324_v14 = vpop.f32.mrb[1].mxu1 }
  0xf1   :  { %v265_v15 = vadd.f32 %v264_v13, %v72_v0  ;;  %v325_v16 = vadd.f32 %v324_v14, %v132_v8  ;;  %v1094_v8 = vld [vmem:[%s1155_s5] sm:$0x7] }
  0xf2   :  { %v345_v19 = vsel %vm343_vm2, %v270_v11, -inf  ;;  %v399_v20 = vsel %vm343_vm2, %v330_v12, -inf }
  0xf3   :  { %v344_v21 = vsel %vm343_vm2, %v265_v15, -inf  ;;  %v398_v22 = vsel %vm343_vm2, %v325_v16, -inf  ;;  %v727_v23 = vpop.f32.mrb[2].mxu0  ;;  %v745_v24 = vpop.f32.mrb[2].mxu1 }
  0xf4   :  { %v346_v25 = vmax.f32 %v344_v21, %v345_v19  ;;  %v400_v26 = vmax.f32 %v398_v22, %v399_v20  ;;  %v280_v27 = vadd.f32 %v727_v23, %v87_v62  ;;  %v340_v28 = vadd.f32 %v745_v24, %v147_v17  ;;  %v274_v29 = vpop.f32.mrb[3].mxu0  ;;  %v334_v30 = vpop.f32.mrb[3].mxu1 }
  0xf5   :  { %v275_v31 = vadd.f32 %v274_v29, %v82_v60  ;;  %v335_v32 = vadd.f32 %v334_v30, %v142_v18 }
  0xf6   :  { %v347_v33 = vrot.slane %v346_v25, 4  ;;  %v354_v35 = vsel %vm343_vm2, %v280_v27, -inf  ;;  %v408_v36 = vsel %vm343_vm2, %v340_v28, -inf  ;;  %v401_v48 = vrot.slane %v400_v26, 4 }
  0xf7   :  { %v353_v37 = vsel %vm343_vm2, %v275_v31, -inf  ;;  %v407_v38 = vsel %vm343_vm2, %v335_v32, -inf  ;;  %v730_v39 = vpop.f32.mrb[4].mxu0 }
  0xf8   :  { %v348_v40 = vmax.f32 %v346_v25, %v347_v33  ;;  %v355_v41 = vmax.f32 %v353_v37, %v354_v35  ;;  %v409_v42 = vmax.f32 %v407_v38, %v408_v36  ;;  %v284_v43 = vpop.f32.mrb[5].mxu0  ;;  %v290_v44 = vadd.f32 %v730_v39, %v97_v61 }
  0xf9   :  { %v285_v45 = vadd.f32 %v284_v43, %v92_v59  ;;  %v418_v59 = vsub.s32 0, %v1086_v47  ;;  %v402_v61 = vmax.f32 %v400_v26, %v401_v48 }
  0xfa   :  { %v349_v46 = vrot.slane %v348_v40, 2  ;;  %v356_v49 = vrot.slane %v355_v41, 4  ;;  %v363_v50 = vsel %vm343_vm2, %v290_v44, -inf  ;;  %v410_v56 = vrot.slane %v409_v42, 4 }
  0xfb   :  { %v362_v51 = vsel %vm343_vm2, %v285_v45, -inf  ;;  %v733_v52 = vpop.f32.mrb[6].mxu0  ;;  %v1101_v19 = vrot.slane %v1094_v8, %v418_v59  ;;  %v403_v20 = vrot.slane %v402_v61, 2 }
  0xfc   :  { %v350_v53 = vmax.f32 %v348_v40, %v349_v46  ;;  %v357_v55 = vmax.f32 %v355_v41, %v356_v49  ;;  %v294_v57 = vpop.f32.mrb[7].mxu0  ;;  %v364_v60 = vmax.f32 %v362_v51, %v363_v50  ;;  %v300_v62 = vadd.f32 %v733_v52, %v107_v1 }
  0xfd   :  { %v295_v63 = vadd.f32 %v294_v57, %v102_v2  ;;  %v411_v14 = vmax.f32 %v409_v42, %v410_v56  ;;  %v404_v36 = vmax.f32 %v402_v61, %v403_v20 }
  0xfe   :  { %v351_v0 = vrot.slane %v350_v53, 1  ;;  %v358_v7 = vrot.slane %v357_v55, 2  ;;  %v365_v9 = vrot.slane %v364_v60, 4  ;;  %v372_v10 = vsel %vm343_vm2, %v300_v62, -inf }
  0xff   :  { %v371_v11 = vsel %vm343_vm2, %v295_v63, -inf  ;;  %v736_v12 = vpop.f32.mrb[8].mxu0  ;;  %v412_v28 = vrot.slane %v411_v14, 2  ;;  %v405_v46 = vrot.slane %v404_v36, 1 }
 0x100   :  { %v359_v13 = vmax.f32 %v357_v55, %v358_v7  ;;  %v304_v1 = vpop.f32.mrb[9].mxu0  ;;  %v366_v2 = vmax.f32 %v364_v60, %v365_v9  ;;  %v373_v15 = vmax.f32 %v371_v11, %v372_v10  ;;  %v310_v16 = vadd.f32 %v736_v12, %v1070_v3 }
 0x101   :  { %v305_v17 = vadd.f32 %v304_v1, %v1072_v4  ;;  %v352_v18 = vmax.f32 %v350_v53, %v351_v0  ;;  %v413_v40 = vmax.f32 %v411_v14, %v412_v28  ;;  %v406_v56 = vmax.f32 %v404_v36, %v405_v46 }
 0x102   :  { %v360_v21 = vrot.slane %v359_v13, 1  ;;  %v367_v22 = vrot.slane %v366_v2, 2  ;;  %v374_v23 = vrot.slane %v373_v15, 4  ;;  %v381_v24 = vsel %vm343_vm2, %v310_v16, -inf }
 0x103   :  { %v380_v25 = vsel %vm343_vm2, %v305_v17, -inf  ;;  %v739_v26 = vpop.f32.mrb[10].mxu0  ;;  %v420_v32 = vadd.f32 %v1101_v19, %v352_v18  ;;  %v414_v50 = vrot.slane %v413_v40, 1  ;;  %v426_v7 = vadd.f32 %v1101_v19, %v406_v56 }
 0x104   :  { %v361_v27 = vmax.f32 %v359_v13, %v360_v21  ;;  %v382_v29 = vmax.f32 %v380_v25, %v381_v24  ;;  %v314_v30 = vpop.f32.mrb[11].mxu0  ;;  %v368_v3 = vmax.f32 %v366_v2, %v367_v22  ;;  %v375_v31 = vmax.f32 %v373_v15, %v374_v23 }
 0x105   :  { %v320_v4 = vadd.f32 %v739_v26, %v1074_v5  ;;  %v315_v35 = vadd.f32 %v314_v30, %v1076_v6  ;;  %v415_v62 = vmax.f32 %v413_v40, %v414_v50 }
 0x106   :  { %v421_v33 = vadd.f32 %v1101_v19, %v361_v27  ;;  %v383_v34 = vrot.slane %v382_v29, 4  ;;  %v369_v37 = vrot.slane %v368_v3, 1  ;;  %v376_v38 = vrot.slane %v375_v31, 2 }
 0x107   :  { %v390_v39 = vsel %vm343_vm2, %v320_v4, -inf  ;;  %v389_v42 = vsel %vm343_vm2, %v315_v35, -inf  ;;  %v427_v12 = vadd.f32 %v1101_v19, %v415_v62  ;;  %v547_v4 = vld [vmem:[%s1154_s4 + $0x8] sm:$0xff] }
 0x108   :  { %823 = vtanh.f32 %v421_v33  ;;  %v384_v41 = vmax.f32 %v382_v29, %v383_v34  ;;  %v370_v43 = vmax.f32 %v368_v3, %v369_v37  ;;  %v377_v44 = vmax.f32 %v375_v31, %v376_v38  ;;  %v546_v31 = vld [vmem:[%s1154_s4] sm:$0xff]  ;;  %v549_v34 = vld [vmem:[%s1154_s4 + $0x18] sm:$0xff] }
 0x109   :  { %v391_v5 = vmax.f32 %v389_v42, %v390_v39  ;;  %825 = vtanh.f32 %v420_v32  ;;  %v548_v32 = vld [vmem:[%s1154_s4 + $0x10] sm:$0xff]  ;;  %v799_v33 = vpack.c.bf16 %v547_v4, %v546_v31  ;;  %s869_s4 = smov [#allocation2]  }
 0x10a   :  { %v385_v45 = vrot.slane %v384_v41, 2  ;;  %v422_v48 = vadd.f32 %v1101_v19, %v370_v43  ;;  %v378_v49 = vrot.slane %v377_v44, 1  ;;  %v802_v35 = vpack.c.bf16 %v549_v34, %v548_v32  ;;  %s634_s24 = sshll.u32 %s869_s4, 4  ;;  %s635_s24 = int_to_ptr.vmem [resolvable:$true] %s634_s24 }
 0x10b   :  { %v392_v6 = vrot.slane %v391_v5, 4  ;;  %s841_s25 = scalar_lea.vmem %s635_s24, 128  ;;  %p846_p1 = scmp.lt.s32.totalorder %s635_s24, %s635_s24 }
 0x10c   :  { %v386_v51 = vmax.f32 %v384_v41, %v385_v45  ;;  %827 = vtanh.f32 %v422_v48  ;;  %v379_v52 = vmax.f32 %v377_v44, %v378_v49  ;;  %v552_v41 = vsub.s32 2, %v1086_v47  ;;  %p842_p0 = scmp.ne.s32.totalorder %s635_s24, %s841_s25  ;;  %p847_p2 = scmp.lt.s32.totalorder %s841_s25, %s841_s25 }
 0x10d   :  { %v393_v53 = vmax.f32 %v391_v5, %v392_v6 }
 0x10e   :  { %v387_v55 = vrot.slane %v386_v51, 1  ;;  %v423_v57 = vadd.f32 %v1101_v19, %v379_v52  ;;  %v553_v42 = vrot.slane %v1094_v8, %v552_v41  ;;  %p848_p3 = por %p847_p2, %p846_p1 }
 0x10f   :  { %v394_v60 = vrot.slane %v393_v53, 2 }
 0x110   :  { %v388_v63 = vmax.f32 %v386_v51, %v387_v55  ;;  %829 = vtanh.f32 %v423_v57  ;;  %p849_p4 = pnand %p848_p3, %p842_p0 }
 0x111   :  { %v395_v0 = vmax.f32 %v393_v53, %v394_v60 }
 0x112   :  { %v824_v59 = vpop.eup %823  ;;  %v424_v61 = vadd.f32 %v1101_v19, %v388_v63 }
 0x113   :  { %v452_v9 = vrot.slane %v824_v59, 7  ;;  %v396_v10 = vrot.slane %v395_v0, 1  ;;  %v826_v11 = vpop.eup %825 }
 0x114   :  { %831 = vtanh.f32 %v424_v61 }
 0x115   :  { %v454_v13 = vsel %vm453_vm3, %v452_v9, %v826_v11  ;;  %v397_v14 = vmax.f32 %v395_v0, %v396_v10  ;;  %833 = vtanh.f32 %v426_v7 }
 0x116   :  { %v828_v1 = vpop.eup %827  ;;  %835 = vtanh.f32 %v427_v12 }
 0x117   :  { %v425_v2 = vadd.f32 %v1101_v19, %v397_v14  ;;  %v455_v15 = vrot.slane %v828_v1, 6 }
 0x119   :  { %837 = vtanh.f32 %v425_v2  ;;  %v457_v16 = vsel %vm456_vm4, %v455_v15, %v454_v13 }
 0x11a   :  { %v830_v17 = vpop.eup %829 }
 0x11b   :  { %v458_v18 = vrot.slane %v830_v17, 5 }
 0x11d   :  { %v460_v21 = vsel %vm459_vm5, %v458_v18, %v457_v16 }
 0x11e   :  { %v832_v20 = vpop.eup %831 }
 0x11f   :  { %v461_v22 = vrot.slane %v832_v20, 4  ;;  %v834_v23 = vpop.eup %833 }
 0x120   :  { %v836_v25 = vpop.eup %835  ;;  %v467_v28 = vrot.slane %v834_v23, 2 }
 0x121   :  { %v463_v24 = vsel %vm462_vm6, %v461_v22, %v460_v21  ;;  %v470_v29 = vrot.slane %v836_v25, 1 }
 0x123   :  { %v838_v26 = vpop.eup %837 }
 0x124   :  { %v464_v27 = vrot.slane %v838_v26, 3 }
 0x126   :  { %v466_v19 = vsel %vm465_vm7, %v464_v27, %v463_v24 }
 0x127   :  { %v469_v30 = vsel %vm468_vm8, %v467_v28, %v466_v19 }
 0x128   :  { %v472_v3 = vsel %vm471_vm9, %v470_v29, %v469_v30 }
 0x129   :  { %755 = vmatmul.mubr.msk.f32.vlgmr.msra.gmra.mrb[4].mxu1 %vm343_vm2, %v472_v3 }
 0x12a   :  { %765 = vmatprep.mubr.msk.f32.mxu1 %vm867_vm1, %v868_v58  ;;  %800 = vmatpush3.bf16.msra.mxu1 %v799_v33  ;;  %v442_v58 = vsub.s32 1, %v1086_v47 }
 0x12b   :  { %801 = vmatprep.subr.bf16.mxu1 %v866_v54 }
 0x12c   :  { %v443_v36 = vrot.slane %v1094_v8, %v442_v58 }
 0x12e   :  { %803 = vmatpush3.bf16.msra.mxu1 %v802_v35 }
 0x1fc   :  { %v541_v37 = vpop.f32.mrb[4].mxu1 }
 0x1fd   :  { %v542_v38 = vadd.f32 %v541_v37, %v443_v36  ;;  %v756_v39 = vpop.f32.mrb[5].mxu1 }
 0x1ff   :  { %839 = vtanh.f32 %v542_v38 }
 0x209   :  { %v840_v40 = vpop.eup %839 }
 0x20a   :  { %766 = vmatmul.mubr.msk.f32.vlgmr.msra.gmra.mrb[6].mxu1 %vm343_vm2, %v840_v40 }
 0x2dd   :  { %v623_v43 = vpop.f32.mrb[6].mxu1 }
 0x2de   :  { %v624_v54 = vadd.f32 %v623_v43, %v553_v42  ;;  %v767_v44 = vpop.f32.mrb[7].mxu1 }
 0x2e0   :  { %627 = vst [vmem:[#allocation2] sm:$0xff] %v624_v54 }
 0x2e1   :  { %852 = shalt.err (!%p849_p4)
}
 0x2e2   :  { %s853_s28 = scalar_lea.hbm %s1156_s6, 128 }
 0x2e3   :  { %p854_p5 = scmp.ne.s32.totalorder %s1156_s6, %s853_s28  ;;  %p857_p6 = scmp.lt.u32.totalorder %s853_s28, %s1156_s6 }
 0x2e5   :  { %p859_p7 = pnand %p857_p6, %p854_p5 }
 0x2e7   :  { %862 = shalt.err (!%p859_p7)
}
 0x2e8   :  { %637 = dma.vmem_to_hbm [thread:$0]  %s635_s24, 128, %s1156_s6, [#allocation3]  }
 0x2e9   :  { %863 = dma.done.wait [#allocation3], 128  }
 0x2ea   :  { %864 = vsyncadd [#allocation3], 4294967168 }
 0x2eb   :  { %641 = vsyncpa [#allocation3], 1 }

</bundles_post_ra>
